<compile_context>
chip_gen: v7x
topology: tpu7x:2x2x1
jax: 0.10.0
libtpu: 0.0.40
codegen_flags: <defaults>
</compile_context>

<pallas_src>
import functools
import math

import jax
import jax.numpy as jnp
from jax.experimental import pallas as pl
from jax.experimental.pallas import tpu as pltpu


def _build_pe_table(d_model: int, max_len: int) -> jnp.ndarray:
    """Deterministic sinusoidal table, shape (1, max_len, d_model), float32."""
    position = jnp.arange(0, max_len, dtype=jnp.float32)[:, None]
    div_term = jnp.exp(
        jnp.arange(0, d_model, 2, dtype=jnp.float32) * (-math.log(10000.0) / d_model)
    )
    angles = position * div_term
    pe = jnp.zeros((max_len, d_model), dtype=jnp.float32)
    pe = pe.at[:, 0::2].set(jnp.sin(angles))
    pe = pe.at[:, 1::2].set(jnp.cos(angles))
    return pe[None, :, :]


def _add_pe_kernel(x_ref, pe_ref, o_ref):
    # x_ref, pe_ref, o_ref are matching (rows, W) VMEM tiles.
    o_ref[...] = (x_ref[...] + pe_ref[...]).astype(o_ref.dtype)


def _sublane_multiple(dtype) -> int:
    return {4: 8, 2: 16, 1: 32}.get(jnp.dtype(dtype).itemsize, 8)


@functools.partial(
    jax.jit, static_argnames=("target_tile_bytes", "vmem_tile_budget")
)
def positional_encoding_forward(
    x: jnp.ndarray,
    pe: jnp.ndarray,
    *,
    target_tile_bytes: int = 2 * 1024 * 1024,      # ~2 MiB x-tile -> ~85% HBM roofline
    vmem_tile_budget: int = 24 * 1024 * 1024,       # 6 double-buffered tiles must fit
) -> jnp.ndarray:
    """x: (B, S, D), pe: (1, max_len, D)  ->  (B, S, D) = x + pe[:, :S]."""
    B, S, D = x.shape
    max_len = pe.shape[1]
    if S > max_len:
        raise ValueError(f"seq_len {S} exceeds positional-encoding max_len {max_len}")

    dtype = x.dtype
    itemsize = jnp.dtype(dtype).itemsize
    sub = _sublane_multiple(dtype)

    # ---- lane-dense re-view -------------------------------------------------
    if (S * D) % 128 == 0:
        W = 128                      # unmasked full-lane stores regardless of D
        P = (S * D) // 128           # rows of one sequence's positional pattern
    else:
        # TODO(synk): S*D not a multiple of 128 -> last dim stays D; stores may be
        # masked (vst.msk).  Correct, just below peak store efficiency.
        W = D
        P = S

    R = B * P                        # total rows of the flattened problem
    per_row_bytes = W * itemsize
    max_rows = max(sub, vmem_tile_budget // (6 * per_row_bytes))
    target_rows = max(sub, target_tile_bytes // per_row_bytes)

    pe_flat = pe[0, :S, :].astype(dtype).reshape(P, W)   # (P, W), cast once (see note)

    unit = (P * sub) // math.gcd(P, sub)                  # lcm(P, sublane multiple)
    limit_rows = min(R, max_rows)
    vmem_limit = max(32 * 1024 * 1024, vmem_tile_budget + 8 * 1024 * 1024)

    if unit <= limit_rows:
        # ---- Regime A: row tile covers whole pe periods; pe is one constant block.
        k = max(1, min(limit_rows // unit, max(1, target_rows // unit)))
        tr = k * unit
        x2 = x.reshape(R, W)
        reps = tr // P
        pe_arg = jnp.tile(pe_flat, (reps, 1)) if reps > 1 else pe_flat   # (tr, W)

        out2 = pl.pallas_call(
            _add_pe_kernel,
            out_shape=jax.ShapeDtypeStruct((R, W), dtype),
            grid_spec=pltpu.PrefetchScalarGridSpec(
                num_scalar_prefetch=0,
                grid=(pl.cdiv(R, tr),),
                in_specs=[
                    pl.BlockSpec((tr, W), lambda r: (r, 0)),   # x rows
                    pl.BlockSpec((tr, W), lambda r: (0, 0)),   # pe: constant block -> DMA'd once
                ],
                out_specs=pl.BlockSpec((tr, W), lambda r: (r, 0)),
            ),
            compiler_params=pltpu.CompilerParams(
                dimension_semantics=("parallel",),
                vmem_limit_bytes=vmem_limit,
            ),
        )(x2, pe_arg)
        return out2.reshape(B, S, D)

    # ---- Regime B: one pe period is too long (or too few rows total).
    # 2-D grid: seq-tile axis OUTER, batch axis INNER, so the pe block index only
    # changes with the seq-tile -> pe HBM traffic ~= S*D bytes total.
    cap = min(P, max_rows, max(target_rows, sub))
    if cap >= P:
        ts = P                                   # full period (full-extent block OK)
    else:
        ts = max(sub, cap - cap % sub)           # sublane-aligned sub-period tile
    nt = pl.cdiv(P, ts)

    x3 = x.reshape(B, P, W)
    out3 = pl.pallas_call(
        _add_pe_kernel,
        out_shape=jax.ShapeDtypeStruct((B, P, W), dtype),
        grid_spec=pltpu.PrefetchScalarGridSpec(
            num_scalar_prefetch=0,
            grid=(nt, B),
            in_specs=[
                pl.BlockSpec((None, ts, W), lambda t, b: (b, t, 0)),  # x
                pl.BlockSpec((ts, W), lambda t, b: (t, 0)),           # pe (batch-invariant)
            ],
            out_specs=pl.BlockSpec((None, ts, W), lambda t, b: (b, t, 0)),
        ),
        compiler_params=pltpu.CompilerParams(
            dimension_semantics=("parallel", "parallel"),
            vmem_limit_bytes=vmem_limit,
        ),
    )(x3, pe_flat)
    return out3.reshape(B, S, D)


def _check(key, B, S, D, max_len, dtype=jnp.float32, atol=1e-6, rtol=1e-6, **kw):
    x = jax.random.normal(key, (B, S, D), dtype=jnp.float32).astype(dtype)
    pe = _build_pe_table(D, max_len)
    out = jax.block_until_ready(positional_encoding_forward(x, pe, **kw))
    # Reference matches the kernel's documented semantics: pe rounded to x.dtype.
    ref = x + pe[:, :S, :].astype(dtype)
    assert out.shape == (B, S, D)
    assert out.dtype == dtype
    ok = jnp.allclose(out.astype(jnp.float32), ref.astype(jnp.float32),
                      atol=atol, rtol=rtol)
    assert bool(ok), ("mismatch", B, S, D, str(dtype))


if __name__ == "__main__":
    root = jax.random.PRNGKey(0)
    k0, k1, k2, k3, k4 = jax.random.split(root, 5)

    # Canonical small shape (D=32): lane-dense W=128 re-view, tiny Regime B grid.
    _check(k0, B=2, S=8, D=32, max_len=64)

    # Regime A with multi-step grid and a partial final row block.
    _check(k1, B=5, S=8, D=128, max_len=64, target_tile_bytes=8192)

    # Regime B with sub-period tiles (forced via a tiny VMEM budget): grid (2, B).
    _check(k2, B=2, S=64, D=128, max_len=128, vmem_tile_budget=96 * 1024)

    # Awkward shape (S*D not a multiple of 128): masked-store fallback, W=D.
    _check(k3, B=2, S=3, D=40, max_len=16)

    # bf16 path (sublane multiple 16), Regime A with partial final block.
    _check(k4, B=3, S=16, D=64, max_len=32, dtype=jnp.bfloat16,
           atol=2e-2, rtol=2e-2)

    print("KERNEL_OK")
</pallas_src>

<mosaic_0001>
module attributes {stable_mosaic.version = 11 : i64} {
  func.func @_add_pe_kernel(%arg0: i32, %arg1: i32, %arg2: memref<1x2x128xf32, #tpu.memory_space<vmem>>, %arg3: memref<2x128xf32, #tpu.memory_space<vmem>>, %arg4: memref<1x2x128xf32, #tpu.memory_space<vmem>>) attributes {dimension_semantics = [#tpu.dimension_semantics<parallel>, #tpu.dimension_semantics<parallel>], iteration_bounds = array<i64: 1, 2>, scalar_prefetch = 0 : i64, scratch_operands = 0 : i64, tpu.core_type = #tpu.core_type<tc>, window_params = [{transform_indices = @transform_0, window_bounds = array<i64: 1, 2, 128>}, {transform_indices = @transform_1, window_bounds = array<i64: 2, 128>}, {transform_indices = @transform_2, window_bounds = array<i64: 1, 2, 128>}]} {
    %c0 = arith.constant 0 : index
    %c0_0 = arith.constant 0 : index
    %c0_1 = arith.constant 0 : index
    %0 = vector.load %arg2[%c0, %c0_0, %c0_1] : memref<1x2x128xf32, #tpu.memory_space<vmem>>, vector<1x2x128xf32>
    %1 = vector.shape_cast %0 : vector<1x2x128xf32> to vector<2x128xf32>
    %c0_2 = arith.constant 0 : index
    %c0_3 = arith.constant 0 : index
    %2 = vector.load %arg3[%c0_2, %c0_3] : memref<2x128xf32, #tpu.memory_space<vmem>>, vector<2x128xf32>
    %3 = arith.addf %1, %2 : vector<2x128xf32>
    %c0_4 = arith.constant 0 : index
    %c0_5 = arith.constant 0 : index
    %c0_6 = arith.constant 0 : index
    %4 = vector.load %arg4[%c0_4, %c0_5, %c0_6] : memref<1x2x128xf32, #tpu.memory_space<vmem>>, vector<1x2x128xf32>
    %5 = vector.shape_cast %4 : vector<1x2x128xf32> to vector<2x128xf32>
    %6 = vector.shape_cast %3 : vector<2x128xf32> to vector<1x2x128xf32>
    tpu.vector_store %arg4[%c0_4, %c0_5, %c0_6], %6 {strides = array<i32>} : memref<1x2x128xf32, #tpu.memory_space<vmem>>, vector<1x2x128xf32>,
    return
  }
  func.func @transform_0(%arg0: i32, %arg1: i32) -> (i32, i32, i32) {
    %c0_i32 = arith.constant 0 : i32
    %c0_i32_0 = arith.constant 0 : i32
    return %arg1, %arg0, %c0_i32 : i32, i32, i32
  }
  func.func @transform_1(%arg0: i32, %arg1: i32) -> (i32, i32) {
    %c0_i32 = arith.constant 0 : i32
    %c0_i32_0 = arith.constant 0 : i32
    return %arg0, %c0_i32 : i32, i32
  }
  func.func @transform_2(%arg0: i32, %arg1: i32) -> (i32, i32, i32) {
    %c0_i32 = arith.constant 0 : i32
    %c0_i32_0 = arith.constant 0 : i32
    return %arg1, %arg0, %c0_i32 : i32, i32, i32
  }
}

</mosaic_0001>

<bundles_post_ra>
// kernel: squeeze.1
= control target key start
LH: loop header
LB: loop body
LE: loop exit
PB: predicated region body
PF: predicated region fallthrough
CT: control target
= control target key end

     0   :  { %s7_s6 = smov 3  ;;  %s14_s9 = smov 3  ;;  %vm4_vm0 = vcmask 261120   ;;  %vm11_vm1 = vcmask 1048320   ;;  %vm18_vm2 = vcmask 785920   ;;  %vm25_vm3 = vcmask 523520   ;;  %s67_s0 = inlined_call_operand.vmem [shape: f32[1,8,32], index: 0, kind: input, shape index: {}]   ;;  %s68_s1 = inlined_call_operand.vmem [shape: f32[2,128], index: 1, kind: output, shape index: {}]  }
   0x1   :  { %v33_v0 = vld [vmem:[%s67_s0 + $0x3] ss:$4 sm:%s7_s6]   ;;  %s39_s10 = smov 96   ;;  %s21_s11 = smov 3  ;;  %v34_v1 = vld [vmem:[%s67_s0 + $0x2] ss:$4 sm:%s14_s9]  }
   0x2   :  { %9 = vrot.lane.b32.xlu0 %v33_v0, %s39_s10  ;;  %v35_v2 = vld [vmem:[%s67_s0 + $0x1] ss:$4 sm:%s21_s11]   ;;  %s2_s16 = smov 3  ;;  %s40_s17 = smov 32  }
   0x3   :  { %23 = vrot.lane.b32.xlu1 %v35_v2, %s40_s17  ;;  %v3_v3 = vld [vmem:[%s67_s0] ss:$4 sm:%s2_s16]   ;;  %s41_s0 = smov 64  }
   0x4   :  { %5 = vst.msk [vmem:[#allocation0] sm:$0x3] %vm4_vm0, %v3_v3  }
   0x6   :  { %16 = vrot.lane.b32.xlu0 %v34_v1, %s41_s0 }
  0x74   :  { %v10_v4 = vpop.permute.xlu0 %9  }
  0x75   :  { %12 = vst.msk [vmem:[#allocation0] sm:$0x3] %vm11_vm1, %v10_v4   ;;  %v24_v5 = vpop.permute.xlu1 %23  }
  0x78   :  { %v17_v6 = vpop.permute.xlu0 %16  }
  0x79   :  { %19 = vst.msk [vmem:[#allocation0] sm:$0x3] %vm18_vm2, %v17_v6  }
  0x7a   :  { %26 = vst.msk [vmem:[#allocation0] sm:$0x3] %vm25_vm3, %v24_v5  }
  0x81   :  { %v30_v7 = vld [vmem:[#allocation0] sm:$0x3] }
  0x82   :  { %32 = vst [vmem:[%s68_s1] sm:$0x3] %v30_v7 }

// kernel: positional_encoding_forward.1
= control target key start
LH: loop header
LB: loop body
LE: loop exit
PB: predicated region body
PF: predicated region fallthrough
CT: control target
= control target key end

     0   :  { %s354_s9 = smov 0   ;;  %s331_s10 = smov 0   ;;  %s368_s0 = inlined_call_operand.vmem [shape: f32[2,2,128], index: 0, kind: input, shape index: {}]   ;;  %s369_s1 = inlined_call_operand.vmem [shape: f32[2,128], index: 1, kind: input, shape index: {}]   ;;  %s370_s2 = inlined_call_operand.vmem [shape: f32[2,2,128], index: 2, kind: output, shape index: {}]  }
   0x1   :  { %s335_s11 = smov 0  }
   0x2 LB: > { %s21_s12 = sadd.s32 1, %s333_s10  ;;  %p286_p0 = scmp.ge.s32.totalorder %s337_s11, 1  ;;  %s337_s11 = sphi %s335_s11, %s12_s11   ;;  %s333_s10 = sphi %s331_s10, %s332_s10   ;;  %s329_s9 = sphi %s354_s9, %s371_s9  }
   0x3   : > { %p22_p1 = scmp.ge.s32.totalorder %s21_s12, 2  ;;  %p139_p2 = scmp.lt.s32.totalorder %s337_s11, 3 }
   0x5   : > { %s373_s12 = smov (%p22_p1, %s21_s12), 0  ;;  %p140_p3 = pnand %p286_p0, %p139_p2 }
   0x6   : > { %p169_p4 = scmp.lt.s32.totalorder (!%p140_p3), %s329_s9, 1  ;;  %v188_v0 = vld [vmem:[%s369_s1] sm:$0x3] (!%p140_p3) }
   0x7   : > { %143 = sbr.rel (%p140_p3) target bundleno = 21 (0x15), region = 28 }
   0xe   : > { %s375_s9 = smov (!%p169_p4, %s329_s9), 1 }
   0xf   : > { %s287_s13 = sshll.u32 %s375_s9, 1 }
  0x10   : > { %s175_s18 = scalar_lea.vmem %s368_s0, %s287_s13  ;;  %s186_s21 = scalar_lea.vmem %s370_s2, %s287_s13 }
  0x11   : > { %v187_v1 = vld [vmem:[%s175_s18] sm:$0x3] }
  0x12   : > { %v189_v2 = vadd.f32 %v188_v0, %v187_v1 }
  0x14   : > { %190 = vst [vmem:[%s186_s21] sm:$0x3] %v189_v2 }
  0x15 PF: > { %s12_s11 = sadd.s32 1, %s337_s11   ;;  %s371_s9 = smov %s333_s10 }
  0x16   : > { %p9_p5 = scmp.ge.s32.totalorder %s12_s11, 4   ;;  %s332_s10 = smov %s373_s12  }
  0x18   :  { %11 = sbr.rel (!%p9_p5) target bundleno = 2 (0x2), region = 61 }

</bundles_post_ra>
